<compile_context>
chip_gen: v7x
topology: tpu7x:2x2x1
jax: 0.10.0
libtpu: 0.0.40
codegen_flags: <defaults>
</compile_context>

<pallas_src>
import functools

import jax
import jax.numpy as jnp
from jax import lax
from jax.experimental import pallas as pl
from jax.experimental.pallas import tpu as pltpu


# ------------------------------ Pallas kernel ------------------------------ #

def fused_decoder_kernel(p_ref, w_ref, gamma_ref, beta_ref, o_ref):
    """Fused phase-conv + BatchNorm2d (training-mode batch stats) (+ identity act).

    p_ref:     (S2, Kc, Rp)    per-phase im2col patches, Rp = N*Hi*Wi
    w_ref:     (S2, Cout, Kc)  per-phase sub-kernels
    gamma_ref: (Cout, 1)       BN affine scale
    beta_ref:  (Cout, 1)       BN affine shift
    o_ref:     (Cout, S2*Rp)   normalized output, phase-major columns
    """
    S2, _, Rp = p_ref.shape

    # Conv: S2 lane-dense MXU matmuls, concatenated along lanes.
    ys = []
    for ph in range(S2):  # static unroll
        ys.append(jnp.dot(w_ref[ph], p_ref[ph],
                          preferred_element_type=jnp.float32))   # (Cout, Rp)
    y = jnp.concatenate(ys, axis=1)                               # (Cout, S2*Rp)

    # BatchNorm2d training mode: biased variance over N*OH*OW per channel,
    # single-pass sum / sum-of-squares over the lane axis.
    inv_r = 1.0 / (S2 * Rp)
    mean = jnp.sum(y, axis=1, keepdims=True) * inv_r              # (Cout, 1)
    ex2 = jnp.sum(y * y, axis=1, keepdims=True) * inv_r
    var = jnp.maximum(ex2 - mean * mean, 0.0)
    inv_std = lax.rsqrt(var + 1e-5)

    # LeakyReLU(negative_slope=1) is the identity -> omitted.
    o_ref[...] = (y - mean) * (inv_std * gamma_ref[...]) + beta_ref[...]


# ------------------------------ JAX wrapper -------------------------------- #

def _phase_geometry(K, s, p):
    """Phase decomposition of ConvTranspose2d (per spatial dim)."""
    pad = K - 1 - p
    assert pad >= 0, "requires padding <= kernel_size - 1"
    A = -(-K // s)                                      # taps per phase per dim
    k0 = [(pad - r) % s for r in range(s)]              # first flipped tap index
    base = [(r + k0[r] - pad) // s for r in range(s)]   # input offset of tap a=0
    return pad, A, k0, base


@functools.partial(jax.jit, static_argnames=("kernel_size", "stride", "padding",
                                             "output_padding"))
def decoder_block_forward(x_nchw, w_t, conv_bias, gamma, beta, *,
                          kernel_size, stride, padding, output_padding):
    """Forward pass of DecoderBlock. Input/output are NCHW (PyTorch convention)."""
    # Train-mode BatchNorm subtracts the batch mean, so BN(y + b) == BN(y):
    # the ConvTranspose2d bias is mathematically cancelled and not computed.
    del conv_bias

    x = x_nchw.astype(jnp.float32)
    N, Cin, H, W = x.shape
    Cout = w_t.shape[1]
    K, s, p, op = kernel_size, stride, padding, output_padding

    OH = (H - 1) * s - 2 * p + K + op
    OW = (W - 1) * s - 2 * p + K + op
    # TODO(synk): phases of unequal size (OH or OW not divisible by stride) fall
    # outside this lane-dense fast path.
    assert OH % s == 0 and OW % s == 0
    Hi, Wi = OH // s, OW // s

    _, A, k0, base = _phase_geometry(K, s, p)
    lo = min(base)
    hi = max(base) + A - 1
    halo_t = max(0, -lo)
    halo_b = max(0, (Hi - 1) + hi - (H - 1))
    halo_l = max(0, -lo)
    halo_r = max(0, (Wi - 1) + hi - (W - 1))
    xp = jnp.pad(x, ((0, 0), (0, 0), (halo_t, halo_b), (halo_l, halo_r)))

    # Flipped / channel-transposed weight: wflip[kh,kw,ci,co] = w[ci,co,K-1-kh,K-1-kw]
    wflip = jnp.transpose(w_t[:, :, ::-1, ::-1], (2, 3, 0, 1)).astype(jnp.float32)

    S2 = s * s
    Kc = A * A * Cin
    Rp = N * Hi * Wi

    # Build per-phase im2col patches (rows = (a,b,ci)) and sub-kernels.
    p_phases, w_phases = [], []
    for r in range(s):
        for c in range(s):
            taps, wt = [], []
            for a in range(A):
                kh = k0[r] + s * a
                oh_off = base[r] + a + halo_t
                for b in range(A):
                    kw = k0[c] + s * b
                    ow_off = base[c] + b + halo_l
                    sl = xp[:, :, oh_off:oh_off + Hi, ow_off:ow_off + Wi]  # (N,Cin,Hi,Wi)
                    taps.append(jnp.transpose(sl, (1, 0, 2, 3)))           # (Cin,N,Hi,Wi)
                    if kh < K and kw < K:
                        wt.append(wflip[kh, kw])                            # (Cin, Cout)
                    else:
                        wt.append(jnp.zeros((Cin, Cout), jnp.float32))
            p_phases.append(jnp.stack(taps, 0).reshape(Kc, Rp))
            w_phases.append(jnp.transpose(jnp.stack(wt, 0), (2, 0, 1)).reshape(Cout, Kc))

    p_all = jnp.stack(p_phases, 0)                      # (S2, Kc, Rp)
    w_all = jnp.stack(w_phases, 0)                      # (S2, Cout, Kc)
    gamma2 = gamma.reshape(Cout, 1).astype(jnp.float32)
    beta2 = beta.reshape(Cout, 1).astype(jnp.float32)

    flops = 2 * S2 * Cout * Kc * Rp + 8 * Cout * S2 * Rp
    bytes_accessed = 4 * (p_all.size + w_all.size + 2 * Cout + Cout * S2 * Rp)

    y = pl.pallas_call(
        fused_decoder_kernel,
        out_shape=jax.ShapeDtypeStruct((Cout, S2 * Rp), jnp.float32),
        grid=(1,),
        in_specs=[
            pl.BlockSpec((S2, Kc, Rp), lambda i: (0, 0, 0)),
            pl.BlockSpec((S2, Cout, Kc), lambda i: (0, 0, 0)),
            pl.BlockSpec((Cout, 1), lambda i: (0, 0)),
            pl.BlockSpec((Cout, 1), lambda i: (0, 0)),
        ],
        out_specs=pl.BlockSpec((Cout, S2 * Rp), lambda i: (0, 0)),
        compiler_params=pltpu.CompilerParams(dimension_semantics=("arbitrary",)),
        cost_estimate=pl.CostEstimate(flops=flops, transcendentals=Cout,
                                      bytes_accessed=bytes_accessed),
    )(p_all, w_all, gamma2, beta2)

    # Columns are ordered (phase_r, phase_c, n, i, j): depth-to-space back to NCHW.
    y6 = y.reshape(Cout, s, s, N, Hi, Wi)
    out = jnp.transpose(y6, (3, 0, 4, 1, 5, 2)).reshape(N, Cout, OH, OW)
    return out


# --------------------------- pure-JAX reference ----------------------------- #

def decoder_block_reference(x_nchw, w_t, conv_bias, gamma, beta, *,
                            kernel_size, stride, padding, output_padding):
    x = jnp.transpose(x_nchw, (0, 2, 3, 1)).astype(jnp.float32)
    K = kernel_size
    pad = K - 1 - padding
    w_conv = jnp.transpose(w_t[:, :, ::-1, ::-1], (2, 3, 0, 1)).astype(jnp.float32)
    y = lax.conv_general_dilated(
        x, w_conv, window_strides=(1, 1),
        padding=((pad, pad + output_padding), (pad, pad + output_padding)),
        lhs_dilation=(stride, stride),
        dimension_numbers=("NHWC", "HWIO", "NHWC")) + conv_bias[None, None, None, :]
    mean = jnp.mean(y, axis=(0, 1, 2), keepdims=True)
    var = jnp.mean((y - mean) ** 2, axis=(0, 1, 2), keepdims=True)  # biased (PyTorch BN)
    out = (y - mean) * lax.rsqrt(var + 1e-5) * gamma + beta
    out = jnp.where(out >= 0, out, 1.0 * out)                        # LeakyReLU(1)
    return jnp.transpose(out, (0, 3, 1, 2))


# ---------------------------------- main ------------------------------------ #

if __name__ == "__main__":
    # DecoderBlock(in_channels=4, out_channels=8, kernel_size=4, stride=2,
    #              padding=1, output_padding=0): (2,4,16,16) -> (2,8,32,32)
    in_channels, out_channels = 4, 8
    kernel_size, stride, padding, output_padding = 4, 2, 1, 0
    N, H, W = 2, 16, 16

    key = jax.random.PRNGKey(0)
    k_x, k_w, k_b, k_g, k_be = jax.random.split(key, 5)

    x = jax.random.normal(k_x, (N, in_channels, H, W), jnp.float32)
    # nn.ConvTranspose2d weight: (in_channels, out_channels, kH, kW), bias: (out_channels,)
    w_t = 0.1 * jax.random.normal(
        k_w, (in_channels, out_channels, kernel_size, kernel_size), jnp.float32)
    conv_bias = 0.1 * jax.random.normal(k_b, (out_channels,), jnp.float32)
    # nn.BatchNorm2d affine params (deterministic, non-trivial values)
    gamma = 1.0 + 0.1 * jax.random.normal(k_g, (out_channels,), jnp.float32)
    beta = 0.1 * jax.random.normal(k_be, (out_channels,), jnp.float32)

    out = decoder_block_forward(
        x, w_t, conv_bias, gamma, beta,
        kernel_size=kernel_size, stride=stride, padding=padding,
        output_padding=output_padding)
    out = jax.block_until_ready(out)

    ref = decoder_block_reference(
        x, w_t, conv_bias, gamma, beta,
        kernel_size=kernel_size, stride=stride, padding=padding,
        output_padding=output_padding)

    assert out.shape == (N, out_channels, 32, 32), out.shape
    assert jnp.allclose(out, ref, atol=1e-3, rtol=1e-3), "mismatch vs reference"

    print("KERNEL_OK")
</pallas_src>

<mosaic_0001>
module attributes {stable_mosaic.version = 11 : i64} {
  func.func @fused_decoder_kernel(%arg0: i32, %arg1: memref<4x16x512xf32, #tpu.memory_space<vmem>>, %arg2: memref<4x8x16xf32, #tpu.memory_space<vmem>>, %arg3: memref<8x1xf32, #tpu.memory_space<vmem>>, %arg4: memref<8x1xf32, #tpu.memory_space<vmem>>, %arg5: memref<8x2048xf32, #tpu.memory_space<vmem>>) attributes {dimension_semantics = [#tpu.dimension_semantics<arbitrary>], iteration_bounds = array<i64: 1>, scalar_prefetch = 0 : i64, scratch_operands = 0 : i64, tpu.core_type = #tpu.core_type<tc>, window_params = [{pipeline_mode = #tpu.pipeline_mode<synchronous>, transform_indices = @transform_0, window_bounds = array<i64: 4, 16, 512>}, {pipeline_mode = #tpu.pipeline_mode<synchronous>, transform_indices = @transform_1, window_bounds = array<i64: 4, 8, 16>}, {pipeline_mode = #tpu.pipeline_mode<synchronous>, transform_indices = @transform_2, window_bounds = array<i64: 8, 1>}, {pipeline_mode = #tpu.pipeline_mode<synchronous>, transform_indices = @transform_3, window_bounds = array<i64: 8, 1>}, {pipeline_mode = #tpu.pipeline_mode<synchronous>, transform_indices = @transform_4, window_bounds = array<i64: 8, 2048>}]} {
    %c0 = arith.constant 0 : index
    %c0_0 = arith.constant 0 : index
    %c0_1 = arith.constant 0 : index
    %0 = vector.load %arg2[%c0, %c0_0, %c0_1] : memref<4x8x16xf32, #tpu.memory_space<vmem>>, vector<1x8x16xf32>
    %1 = vector.shape_cast %0 : vector<1x8x16xf32> to vector<8x16xf32>
    %c0_2 = arith.constant 0 : index
    %c0_3 = arith.constant 0 : index
    %c0_4 = arith.constant 0 : index
    %2 = vector.load %arg1[%c0_2, %c0_3, %c0_4] : memref<4x16x512xf32, #tpu.memory_space<vmem>>, vector<1x16x512xf32>
    %3 = vector.shape_cast %2 : vector<1x16x512xf32> to vector<16x512xf32>
    %cst = arith.constant dense<0.000000e+00> : vector<8x512xf32>
    %4 = tpu.matmul %1, %3, %cst {dimension_numbers = #tpu.dot_dimension_numbers<[1], [0], [0], [1], [0, 0, 1, 1], [], []>} : vector<8x16xf32>, vector<16x512xf32>, vector<8x512xf32> -> vector<8x512xf32>
    %c1 = arith.constant 1 : index
    %c0_5 = arith.constant 0 : index
    %c0_6 = arith.constant 0 : index
    %5 = vector.load %arg2[%c1, %c0_5, %c0_6] : memref<4x8x16xf32, #tpu.memory_space<vmem>>, vector<1x8x16xf32>
    %6 = vector.shape_cast %5 : vector<1x8x16xf32> to vector<8x16xf32>
    %c1_7 = arith.constant 1 : index
    %c0_8 = arith.constant 0 : index
    %c0_9 = arith.constant 0 : index
    %7 = vector.load %arg1[%c1_7, %c0_8, %c0_9] : memref<4x16x512xf32, #tpu.memory_space<vmem>>, vector<1x16x512xf32>
    %8 = vector.shape_cast %7 : vector<1x16x512xf32> to vector<16x512xf32>
    %cst_10 = arith.constant dense<0.000000e+00> : vector<8x512xf32>
    %9 = tpu.matmul %6, %8, %cst_10 {dimension_numbers = #tpu.dot_dimension_numbers<[1], [0], [0], [1], [0, 0, 1, 1], [], []>} : vector<8x16xf32>, vector<16x512xf32>, vector<8x512xf32> -> vector<8x512xf32>
    %c2 = arith.constant 2 : index
    %c0_11 = arith.constant 0 : index
    %c0_12 = arith.constant 0 : index
    %10 = vector.load %arg2[%c2, %c0_11, %c0_12] : memref<4x8x16xf32, #tpu.memory_space<vmem>>, vector<1x8x16xf32>
    %11 = vector.shape_cast %10 : vector<1x8x16xf32> to vector<8x16xf32>
    %c2_13 = arith.constant 2 : index
    %c0_14 = arith.constant 0 : index
    %c0_15 = arith.constant 0 : index
    %12 = vector.load %arg1[%c2_13, %c0_14, %c0_15] : memref<4x16x512xf32, #tpu.memory_space<vmem>>, vector<1x16x512xf32>
    %13 = vector.shape_cast %12 : vector<1x16x512xf32> to vector<16x512xf32>
    %cst_16 = arith.constant dense<0.000000e+00> : vector<8x512xf32>
    %14 = tpu.matmul %11, %13, %cst_16 {dimension_numbers = #tpu.dot_dimension_numbers<[1], [0], [0], [1], [0, 0, 1, 1], [], []>} : vector<8x16xf32>, vector<16x512xf32>, vector<8x512xf32> -> vector<8x512xf32>
    %c3 = arith.constant 3 : index
    %c0_17 = arith.constant 0 : index
    %c0_18 = arith.constant 0 : index
    %15 = vector.load %arg2[%c3, %c0_17, %c0_18] : memref<4x8x16xf32, #tpu.memory_space<vmem>>, vector<1x8x16xf32>
    %16 = vector.shape_cast %15 : vector<1x8x16xf32> to vector<8x16xf32>
    %c3_19 = arith.constant 3 : index
    %c0_20 = arith.constant 0 : index
    %c0_21 = arith.constant 0 : index
    %17 = vector.load %arg1[%c3_19, %c0_20, %c0_21] : memref<4x16x512xf32, #tpu.memory_space<vmem>>, vector<1x16x512xf32>
    %18 = vector.shape_cast %17 : vector<1x16x512xf32> to vector<16x512xf32>
    %cst_22 = arith.constant dense<0.000000e+00> : vector<8x512xf32>
    %19 = tpu.matmul %16, %18, %cst_22 {dimension_numbers = #tpu.dot_dimension_numbers<[1], [0], [0], [1], [0, 0, 1, 1], [], []>} : vector<8x16xf32>, vector<16x512xf32>, vector<8x512xf32> -> vector<8x512xf32>
    %20 = tpu.concatenate %4, %9, %14, %19 in 1 : vector<8x512xf32>, vector<8x512xf32>, vector<8x512xf32>, vector<8x512xf32> -> vector<8x2048xf32>
    %cst_23 = arith.constant dense<0.000000e+00> : vector<8xf32>
    %21 = vector.multi_reduction <add>, %20, %cst_23 [1] : vector<8x2048xf32> to vector<8xf32>
    %22 = vector.shape_cast %21 : vector<8xf32> to vector<8x1xf32>
    %cst_24 = arith.constant 4.8828125E-4 : f32
    %23 = vector.broadcast %cst_24 : f32 to vector<8x1xf32>
    %24 = arith.mulf %22, %23 : vector<8x1xf32>
    %25 = arith.mulf %20, %20 : vector<8x2048xf32>
    %cst_25 = arith.constant dense<0.000000e+00> : vector<8xf32>
    %26 = vector.multi_reduction <add>, %25, %cst_25 [1] : vector<8x2048xf32> to vector<8xf32>
    %27 = vector.shape_cast %26 : vector<8xf32> to vector<8x1xf32>
    %cst_26 = arith.constant 4.8828125E-4 : f32
    %28 = vector.broadcast %cst_26 : f32 to vector<8x1xf32>
    %29 = arith.mulf %27, %28 : vector<8x1xf32>
    %30 = arith.mulf %24, %24 : vector<8x1xf32>
    %31 = arith.subf %29, %30 : vector<8x1xf32>
    %cst_27 = arith.constant 0.000000e+00 : f32
    %32 = vector.broadcast %cst_27 : f32 to vector<8x1xf32>
    %33 = arith.maximumf %31, %32 : vector<8x1xf32>
    %cst_28 = arith.constant 9.99999974E-6 : f32
    %34 = vector.broadcast %cst_28 : f32 to vector<8x1xf32>
    %35 = arith.addf %33, %34 : vector<8x1xf32>
    %36 = math.rsqrt %35 : vector<8x1xf32>
    %37 = vector.broadcast %24 : vector<8x1xf32> to vector<8x2048xf32>
    %38 = arith.subf %20, %37 : vector<8x2048xf32>
    %c0_29 = arith.constant 0 : index
    %c0_30 = arith.constant 0 : index
    %39 = vector.load %arg3[%c0_29, %c0_30] : memref<8x1xf32, #tpu.memory_space<vmem>>, vector<8x1xf32>
    %40 = arith.mulf %36, %39 : vector<8x1xf32>
    %41 = vector.broadcast %40 : vector<8x1xf32> to vector<8x2048xf32>
    %42 = arith.mulf %38, %41 : vector<8x2048xf32>
    %c0_31 = arith.constant 0 : index
    %c0_32 = arith.constant 0 : index
    %43 = vector.load %arg4[%c0_31, %c0_32] : memref<8x1xf32, #tpu.memory_space<vmem>>, vector<8x1xf32>
    %44 = vector.broadcast %43 : vector<8x1xf32> to vector<8x2048xf32>
    %45 = arith.addf %42, %44 : vector<8x2048xf32>
    %c0_33 = arith.constant 0 : index
    %c0_34 = arith.constant 0 : index
    %46 = vector.load %arg5[%c0_33, %c0_34] : memref<8x2048xf32, #tpu.memory_space<vmem>>, vector<8x2048xf32>
    tpu.vector_store %arg5[%c0_33, %c0_34], %45 {strides = array<i32>} : memref<8x2048xf32, #tpu.memory_space<vmem>>, vector<8x2048xf32>,
    return
  }
  func.func @transform_0(%arg0: i32) -> (i32, i32, i32) {
    %c0_i32 = arith.constant 0 : i32
    %c0_i32_0 = arith.constant 0 : i32
    %c0_i32_1 = arith.constant 0 : i32
    %c0_i32_2 = arith.constant 0 : i32
    return %c0_i32, %c0_i32_0, %c0_i32_1 : i32, i32, i32
  }
  func.func @transform_1(%arg0: i32) -> (i32, i32, i32) {
    %c0_i32 = arith.constant 0 : i32
    %c0_i32_0 = arith.constant 0 : i32
    %c0_i32_1 = arith.constant 0 : i32
    %c0_i32_2 = arith.constant 0 : i32
    return %c0_i32, %c0_i32_0, %c0_i32_1 : i32, i32, i32
  }
  func.func @transform_2(%arg0: i32) -> (i32, i32) {
    %c0_i32 = arith.constant 0 : i32
    %c0_i32_0 = arith.constant 0 : i32
    %c0_i32_1 = arith.constant 0 : i32
    return %c0_i32, %c0_i32_0 : i32, i32
  }
  func.func @transform_3(%arg0: i32) -> (i32, i32) {
    %c0_i32 = arith.constant 0 : i32
    %c0_i32_0 = arith.constant 0 : i32
    %c0_i32_1 = arith.constant 0 : i32
    return %c0_i32, %c0_i32_0 : i32, i32
  }
  func.func @transform_4(%arg0: i32) -> (i32, i32) {
    %c0_i32 = arith.constant 0 : i32
    %c0_i32_0 = arith.constant 0 : i32
    %c0_i32_1 = arith.constant 0 : i32
    return %c0_i32, %c0_i32_0 : i32, i32
  }
}

</mosaic_0001>

<bundles_post_ra>
// kernel: decoder_block_forward.1
= control target key start
LH: loop header
LB: loop body
LE: loop exit
PB: predicated region body
PF: predicated region fallthrough
CT: control target
= control target key end

     0   :  { %v851_v3 = vmov 0.0   ;;  %vm26_vm0 = vcmask 130048   ;;  %s1152_s0 = inlined_call_operand.vmem [shape: f32[4,16,512], index: 0, kind: input, shape index: {}]   ;;  %s1153_s1 = inlined_call_operand.vmem [shape: f32[4,8,16], index: 1, kind: input, shape index: {}]   ;;  %s1154_s2 = inlined_call_operand.vmem [shape: f32[8,1], index: 2, kind: input, shape index: {}]   ;;  %s1155_s3 = inlined_call_operand.vmem [shape: f32[8,1], index: 3, kind: input, shape index: {}]   ;;  %s1156_s4 = inlined_call_operand.vmem [shape: f32[8,2048], index: 4, kind: output, shape index: {}]  }
   0x1   :  { %v19_v0 = vld [vmem:[%s1152_s0 + $0x8] sm:$0xff]  ;;  %v18_v2 = vld [vmem:[%s1152_s0] sm:$0xff]  ;;  %94 = vmatprep.mubr.f32.mxu0 %v851_v3  ;;  %165 = vmatprep.mubr.f32.mxu1 %v851_v3  ;;  %v21_v6 = vld [vmem:[%s1152_s0 + $0x18] sm:$0xff] }
   0x2   :  { %v23_v1 = vld [vmem:[%s1152_s0 + $0x28] sm:$0xff]  ;;  %v22_v5 = vld [vmem:[%s1152_s0 + $0x20] sm:$0xff]  ;;  %v25_v7 = vld [vmem:[%s1152_s0 + $0x38] sm:$0xff] }
   0x3   :  { %v813_v4 = vpack.c.bf16 %v23_v1, %v19_v0  ;;  %v815_v8 = vpack.c.bf16 %v22_v5, %v18_v2  ;;  %v817_v9 = vpack.c.bf16 %v25_v7, %v21_v6  ;;  %v20_v10 = vld [vmem:[%s1152_s0 + $0x10] sm:$0xff]  ;;  %v782_v13 = vld [vmem:[%s1152_s0 + $0x48] sm:$0xff]  ;;  %v781_v15 = vld [vmem:[%s1152_s0 + $0x40] sm:$0xff] }
   0x4   :  { %v24_v11 = vld [vmem:[%s1152_s0 + $0x30] sm:$0xff]  ;;  %v786_v14 = vld [vmem:[%s1152_s0 + $0x68] sm:$0xff]  ;;  %v17_v16 = vld [vmem:[%s1153_s1] sm:$0xff] }
   0x5   :  { %814 = vmatprep.subr.bf16.mxu0 %v813_v4  ;;  %v819_v12 = vpack.c.bf16 %v24_v11, %v20_v10  ;;  %818 = vmatprep.subr.bf16.mxu1 %v817_v9  ;;  %v821_v17 = vpack.c.bf16 %v786_v14, %v782_v13  ;;  %v785_v18 = vld [vmem:[%s1152_s0 + $0x60] sm:$0xff]  ;;  %v784_v19 = vld [vmem:[%s1152_s0 + $0x58] sm:$0xff]  ;;  %v783_v22 = vld [vmem:[%s1152_s0 + $0x50] sm:$0xff] }
   0x6   :  { %816 = vmatpush1.bf16.msra.mxu0 %v815_v8  ;;  %v823_v20 = vpack.c.bf16 %v785_v18, %v781_v15  ;;  %v788_v21 = vld [vmem:[%s1152_s0 + $0x78] sm:$0xff]  ;;  %v787_v23 = vld [vmem:[%s1152_s0 + $0x70] sm:$0xff]  ;;  %v793_v26 = vld [vmem:[%s1152_s0 + $0x88] sm:$0xff] }
   0x7   :  { %820 = vmatpush1.bf16.msra.mxu1 %v819_v12  ;;  %822 = vmatprep.subr.bf16.mxu0 %v821_v17  ;;  %v825_v24 = vpack.c.bf16 %v788_v21, %v784_v19  ;;  %v827_v25 = vpack.c.bf16 %v787_v23, %v783_v22  ;;  %v797_v27 = vld [vmem:[%s1152_s0 + $0xa8] sm:$0xff]  ;;  %v792_v28 = vld [vmem:[%s1152_s0 + $0x80] sm:$0xff]  ;;  %v795_v32 = vld [vmem:[%s1152_s0 + $0x98] sm:$0xff] }
   0x8   :  { %v780_v29 = vld [vmem:[%s1153_s1 + $0x8] sm:$0xff]  ;;  %v829_v30 = vpack.c.bf16 %v797_v27, %v793_v26  ;;  %v796_v31 = vld [vmem:[%s1152_s0 + $0xa0] sm:$0xff]  ;;  %v799_v34 = vld [vmem:[%s1152_s0 + $0xb8] sm:$0xff] }
   0x9   :  { %778 = vmatmul.mubr.msk.f32.vlgmr.msra.gmra.mrb[0].mxu0 %vm26_vm0, %v17_v16  ;;  %v831_v33 = vpack.c.bf16 %v796_v31, %v792_v28  ;;  %v794_v35 = vld [vmem:[%s1152_s0 + $0x90] sm:$0xff]  ;;  %826 = vmatprep.subr.bf16.mxu1 %v825_v24  ;;  %v833_v37 = vpack.c.bf16 %v799_v34, %v795_v32  ;;  %v804_v38 = vld [vmem:[%s1152_s0 + $0xc8] sm:$0xff]  ;;  %v803_v40 = vld [vmem:[%s1152_s0 + $0xc0] sm:$0xff] }
   0xa   :  { %779 = vmatmul.mubr.msk.f32.vlgmr.msra.gmra.mrb[0].mxu1 %vm26_vm0, %v17_v16  ;;  %824 = vmatpush1.bf16.msra.mxu0 %v823_v20  ;;  %v798_v36 = vld [vmem:[%s1152_s0 + $0xb0] sm:$0xff]  ;;  %v808_v39 = vld [vmem:[%s1152_s0 + $0xe8] sm:$0xff]  ;;  %v807_v42 = vld [vmem:[%s1152_s0 + $0xe0] sm:$0xff] }
   0xb   :  { %250 = vmatprep.mubr.f32.mxu0 %v851_v3  ;;  %828 = vmatpush1.bf16.msra.mxu1 %v827_v25  ;;  %v835_v41 = vpack.c.bf16 %v798_v36, %v794_v35  ;;  %v806_v43 = vld [vmem:[%s1152_s0 + $0xd8] sm:$0xff]  ;;  %v837_v44 = vpack.c.bf16 %v808_v39, %v804_v38  ;;  %v805_v46 = vld [vmem:[%s1152_s0 + $0xd0] sm:$0xff]  ;;  %v839_v49 = vpack.c.bf16 %v807_v42, %v803_v40 }
   0xc   :  { %321 = vmatprep.mubr.f32.mxu1 %v851_v3  ;;  %830 = vmatprep.subr.bf16.mxu0 %v829_v30  ;;  %v810_v45 = vld [vmem:[%s1152_s0 + $0xf8] sm:$0xff]  ;;  %v809_v47 = vld [vmem:[%s1152_s0 + $0xf0] sm:$0xff] }
   0xd   :  { %789 = vmatmul.mubr.msk.f32.vlgmr.msra.gmra.mrb[2].mxu0 %vm26_vm0, %v780_v29  ;;  %v791_v48 = vld [vmem:[%s1153_s1 + $0x10] sm:$0xff]  ;;  %834 = vmatprep.subr.bf16.mxu1 %v833_v37  ;;  %v841_v50 = vpack.c.bf16 %v810_v45, %v806_v43  ;;  %v843_v51 = vpack.c.bf16 %v809_v47, %v805_v46  ;;  %v802_v52 = vld [vmem:[%s1153_s1 + $0x18] sm:$0xff] }
   0xe   :  { %832 = vmatpush1.bf16.msra.mxu0 %v831_v33  ;;  %406 = vmatprep.mubr.f32.mxu0 %v851_v3 }
   0xf   :  { %790 = vmatmul.mubr.msk.f32.vlgmr.msra.gmra.mrb[2].mxu1 %vm26_vm0, %v780_v29  ;;  %838 = vmatprep.subr.bf16.mxu0 %v837_v44 }
  0x10   :  { %836 = vmatpush1.bf16.msra.mxu1 %v835_v41  ;;  %477 = vmatprep.mubr.f32.mxu1 %v851_v3 }
  0x11   :  { %800 = vmatmul.mubr.msk.f32.vlgmr.msra.gmra.mrb[4].mxu0 %vm26_vm0, %v791_v48  ;;  %842 = vmatprep.subr.bf16.mxu1 %v841_v50 }
  0x12   :  { %840 = vmatpush1.bf16.msra.mxu0 %v839_v49  ;;  %562 = vmatprep.mubr.f32.mxu0 %v851_v3 }
  0x13   :  { %801 = vmatmul.mubr.msk.f32.vlgmr.msra.gmra.mrb[4].mxu1 %vm26_vm0, %v791_v48 }
  0x14   :  { %844 = vmatpush1.bf16.msra.mxu1 %v843_v51  ;;  %633 = vmatprep.mubr.f32.mxu1 %v851_v3  ;;  %v852_v51 = vmov 0  }
  0x15   :  { %811 = vmatmul.mubr.msk.f32.vlgmr.msra.gmra.mrb[6].mxu0 %vm26_vm0, %v802_v52  ;;  %847 = vset.pattern.permute.xlu1 %v852_v51 }
  0x16   :  { %848 = vset.pattern.permute.xlu0 %v852_v51 }
  0x17   :  { %812 = vmatmul.mubr.msk.f32.vlgmr.msra.gmra.mrb[6].mxu1 %vm26_vm0, %v802_v52 }
  0xdc   :  { %v1002_v53 = vpop.f32.mrb[0].mxu0 }
  0xdd   :  { %v658_v54 = vmul.f32 %v1002_v53, %v1002_v53  ;;  %v1006_v55 = vpop.f32.mrb[1].mxu0  ;;  %v1008_v56 = vpop.f32.mrb[0].mxu1 }
  0xde   :  { %v640_v57 = vadd.f32 %v1006_v55, %v1002_v53  ;;  %v659_v58 = vmul.f32 %v1006_v55, %v1006_v55  ;;  %v660_v59 = vmul.f32 %v1008_v56, %v1008_v56  ;;  %v1016_v60 = vpop.f32.mrb[1].mxu1 }
  0xdf   :  { %v661_v3 = vmul.f32 %v1016_v60, %v1016_v60 }
  0xe0   :  { %v674_v61 = vadd.f32 %v659_v58, %v658_v54  ;;  %v641_v62 = vadd.f32 %v640_v57, %v1008_v56  ;;  %v1019_v63 = vpop.f32.mrb[2].mxu0 }
  0xe1   :  { %v1021_v0 = vpop.f32.mrb[3].mxu0  ;;  %v662_v4 = vmul.f32 %v1019_v63, %v1019_v63 }
  0xe2   :  { %v675_v1 = vadd.f32 %v674_v61, %v660_v59  ;;  %v642_v2 = vadd.f32 %v641_v62, %v1016_v60  ;;  %v1028_v5 = vpop.f32.mrb[2].mxu1  ;;  %v663_v13 = vmul.f32 %v1021_v0, %v1021_v0 }
  0xe3   :  { %v1030_v6 = vpop.f32.mrb[3].mxu1  ;;  %v664_v14 = vmul.f32 %v1028_v5, %v1028_v5 }
  0xe4   :  { %v676_v7 = vadd.f32 %v675_v1, %v661_v3  ;;  %v643_v8 = vadd.f32 %v642_v2, %v1019_v63  ;;  %v1033_v9 = vpop.f32.mrb[4].mxu0  ;;  %v665_v23 = vmul.f32 %v1030_v6, %v1030_v6 }
  0xe5   :  { %v1035_v10 = vpop.f32.mrb[5].mxu0  ;;  %v666_v24 = vmul.f32 %v1033_v9, %v1033_v9 }
  0xe6   :  { %v677_v11 = vadd.f32 %v676_v7, %v662_v4  ;;  %v644_v12 = vadd.f32 %v643_v8, %v1021_v0  ;;  %v1042_v15 = vpop.f32.mrb[4].mxu1  ;;  %v667_v31 = vmul.f32 %v1035_v10, %v1035_v10 }
  0xe7   :  { %v1044_v16 = vpop.f32.mrb[5].mxu1  ;;  %v668_v32 = vmul.f32 %v1042_v15, %v1042_v15 }
  0xe8   :  { %v678_v17 = vadd.f32 %v677_v11, %v663_v13  ;;  %v645_v18 = vadd.f32 %v644_v12, %v1028_v5  ;;  %v1047_v19 = vpop.f32.mrb[6].mxu0  ;;  %v669_v37 = vmul.f32 %v1044_v16, %v1044_v16 }
  0xe9   :  { %v1049_v20 = vpop.f32.mrb[7].mxu0  ;;  %v670_v38 = vmul.f32 %v1047_v19, %v1047_v19 }
  0xea   :  { %v679_v21 = vadd.f32 %v678_v17, %v664_v14  ;;  %v646_v22 = vadd.f32 %v645_v18, %v1030_v6  ;;  %v1056_v25 = vpop.f32.mrb[6].mxu1  ;;  %v671_v43 = vmul.f32 %v1049_v20, %v1049_v20 }
  0xeb   :  { %v1058_v26 = vpop.f32.mrb[7].mxu1  ;;  %v672_v44 = vmul.f32 %v1056_v25, %v1056_v25 }
  0xec   :  { %v680_v27 = vadd.f32 %v679_v21, %v665_v23  ;;  %v647_v28 = vadd.f32 %v646_v22, %v1033_v9  ;;  %v673_v47 = vmul.f32 %v1058_v26, %v1058_v26 }
  0xee   :  { %v681_v29 = vadd.f32 %v680_v27, %v666_v24  ;;  %v648_v30 = vadd.f32 %v647_v28, %v1035_v10 }
  0xf0   :  { %v682_v33 = vadd.f32 %v681_v29, %v667_v31  ;;  %v649_v34 = vadd.f32 %v648_v30, %v1042_v15 }
  0xf2   :  { %v683_v35 = vadd.f32 %v682_v33, %v668_v32  ;;  %v650_v36 = vadd.f32 %v649_v34, %v1044_v16 }
  0xf4   :  { %v684_v39 = vadd.f32 %v683_v35, %v669_v37  ;;  %v651_v40 = vadd.f32 %v650_v36, %v1047_v19 }
  0xf6   :  { %v685_v41 = vadd.f32 %v684_v39, %v670_v38  ;;  %v652_v42 = vadd.f32 %v651_v40, %v1049_v20 }
  0xf8   :  { %v686_v45 = vadd.f32 %v685_v41, %v671_v43  ;;  %v653_v46 = vadd.f32 %v652_v42, %v1056_v25 }
  0xfa   :  { %v654_v48 = vadd.f32 %v653_v46, %v1058_v26  ;;  %v687_v49 = vadd.f32 %v686_v45, %v672_v44 }
  0xfc   :  { %655 = vadd.xlane.f32.xlu0 %v654_v48  ;;  %v688_v50 = vadd.f32 %v687_v49, %v673_v47 }
 0x100   :  { %689 = vadd.xlane.f32.xlu0 %v688_v50 }
 0x189   :  { %v656_v52 = vpop.xlane.xlu0 %655 }
 0x18a   :  { %v657_v54 = vmul.f32 0.00048828125, %v656_v52 }
 0x18c   :  { %v692_v57 = vmul.f32 %v657_v54, %v657_v54  ;;  %v697_v58 = vsub.f32 %v1002_v53, %v657_v54  ;;  %v698_v59 = vsub.f32 %v1006_v55, %v657_v54  ;;  %v699_v61 = vsub.f32 %v1008_v56, %v657_v54 }
 0x18d   :  { %v690_v62 = vpop.xlane.xlu0 %689  ;;  %v700_v1 = vsub.f32 %v1016_v60, %v657_v54  ;;  %v701_v2 = vsub.f32 %v1019_v63, %v657_v54  ;;  %v702_v3 = vsub.f32 %v1021_v0, %v657_v54  ;;  %v703_v4 = vsub.f32 %v1028_v5, %v657_v54 }
 0x18e   :  { %v691_v7 = vmul.f32 0.00048828125, %v690_v62  ;;  %v704_v8 = vsub.f32 %v1030_v6, %v657_v54  ;;  %v705_v11 = vsub.f32 %v1033_v9, %v657_v54  ;;  %v706_v53 = vsub.f32 %v1035_v10, %v657_v54  ;;  %v713_v6 = vld [vmem:[%s1154_s2] sm:$0xff] }
 0x18f   :  { %v707_v55 = vsub.f32 %v1042_v15, %v657_v54  ;;  %v708_v56 = vsub.f32 %v1044_v16, %v657_v54  ;;  %v709_v12 = vsub.f32 %v1047_v19, %v657_v54  ;;  %v710_v60 = vsub.f32 %v1049_v20, %v657_v54  ;;  %v736_v15 = vld [vmem:[%s1155_s3] sm:$0xff] }
 0x190   :  { %v693_v63 = vsub.f32 %v691_v7, %v692_v57  ;;  %v711_v0 = vsub.f32 %v1056_v25, %v657_v54  ;;  %v712_v5 = vsub.f32 %v1058_v26, %v657_v54 }
 0x192   :  { %v694_v13 = vmax.f32 %v693_v63, 0.0 }
 0x194   :  { %v695_v14 = vadd.f32 1e-05, %v694_v13 }
 0x196   :  { %849 = vrsqrt.f32 %v695_v14 }
 0x1a0   :  { %v850_v9 = vpop.eup %849 }
 0x1a1   :  { %v714_v10 = vmul.f32 %v850_v9, %v713_v6 }
 0x1a3   :  { %717 = vperm.xlu1 %847, %v714_v10  }
 0x1a7   :  { %739 = vperm.xlu1 %847, %v736_v15  }
 0x222   :  { %v718_v16 = vpop.permute.xlu1 %717 }
 0x223   :  { %v720_v17 = vmul.f32 %v718_v16, %v697_v58  ;;  %v721_v18 = vmul.f32 %v718_v16, %v698_v59  ;;  %v722_v19 = vmul.f32 %v718_v16, %v699_v61  ;;  %v723_v20 = vmul.f32 %v718_v16, %v700_v1 }
 0x224   :  { %v724_v21 = vmul.f32 %v718_v16, %v701_v2  ;;  %v725_v22 = vmul.f32 %v718_v16, %v702_v3  ;;  %v726_v23 = vmul.f32 %v718_v16, %v703_v4  ;;  %v727_v24 = vmul.f32 %v718_v16, %v704_v8 }
 0x225   :  { %v728_v25 = vmul.f32 %v718_v16, %v705_v11  ;;  %v729_v26 = vmul.f32 %v718_v16, %v706_v53  ;;  %v730_v27 = vmul.f32 %v718_v16, %v707_v55  ;;  %v731_v28 = vmul.f32 %v718_v16, %v708_v56 }
 0x226   :  { %v732_v29 = vmul.f32 %v718_v16, %v709_v12  ;;  %v733_v30 = vmul.f32 %v718_v16, %v710_v60  ;;  %v734_v31 = vmul.f32 %v718_v16, %v711_v0  ;;  %v735_v32 = vmul.f32 %v718_v16, %v712_v5  ;;  %v740_v33 = vpop.permute.xlu1 %739 }
 0x227   :  { %v742_v34 = vadd.f32 %v740_v33, %v720_v17  ;;  %v743_v35 = vadd.f32 %v740_v33, %v721_v18  ;;  %v744_v36 = vadd.f32 %v740_v33, %v722_v19  ;;  %v745_v37 = vadd.f32 %v740_v33, %v723_v20 }
 0x228   :  { %v746_v38 = vadd.f32 %v740_v33, %v724_v21  ;;  %v747_v39 = vadd.f32 %v740_v33, %v725_v22  ;;  %v748_v40 = vadd.f32 %v740_v33, %v726_v23  ;;  %v749_v41 = vadd.f32 %v740_v33, %v727_v24 }
 0x229   :  { %v750_v42 = vadd.f32 %v740_v33, %v728_v25  ;;  %v751_v43 = vadd.f32 %v740_v33, %v729_v26  ;;  %v752_v44 = vadd.f32 %v740_v33, %v730_v27  ;;  %v753_v45 = vadd.f32 %v740_v33, %v731_v28  ;;  %758 = vst [vmem:[%s1156_s4] sm:$0xff] %v742_v34 }
 0x22a   :  { %759 = vst [vmem:[%s1156_s4 + $0x8] sm:$0xff] %v743_v35  ;;  %760 = vst [vmem:[%s1156_s4 + $0x10] sm:$0xff] %v744_v36  ;;  %v754_v46 = vadd.f32 %v740_v33, %v732_v29  ;;  %v755_v47 = vadd.f32 %v740_v33, %v733_v30  ;;  %v756_v48 = vadd.f32 %v740_v33, %v734_v31 }
 0x22b   :  { %761 = vst [vmem:[%s1156_s4 + $0x18] sm:$0xff] %v745_v37  ;;  %v757_v49 = vadd.f32 %v740_v33, %v735_v32  ;;  %762 = vst [vmem:[%s1156_s4 + $0x20] sm:$0xff] %v746_v38 }
 0x22c   :  { %763 = vst [vmem:[%s1156_s4 + $0x28] sm:$0xff] %v747_v39  ;;  %764 = vst [vmem:[%s1156_s4 + $0x30] sm:$0xff] %v748_v40 }
 0x22d   :  { %765 = vst [vmem:[%s1156_s4 + $0x38] sm:$0xff] %v749_v41  ;;  %766 = vst [vmem:[%s1156_s4 + $0x40] sm:$0xff] %v750_v42 }
 0x22e   :  { %767 = vst [vmem:[%s1156_s4 + $0x48] sm:$0xff] %v751_v43  ;;  %768 = vst [vmem:[%s1156_s4 + $0x50] sm:$0xff] %v752_v44 }
 0x22f   :  { %769 = vst [vmem:[%s1156_s4 + $0x58] sm:$0xff] %v753_v45  ;;  %770 = vst [vmem:[%s1156_s4 + $0x60] sm:$0xff] %v754_v46 }
 0x230   :  { %771 = vst [vmem:[%s1156_s4 + $0x68] sm:$0xff] %v755_v47  ;;  %772 = vst [vmem:[%s1156_s4 + $0x70] sm:$0xff] %v756_v48 }
 0x231   :  { %773 = vst [vmem:[%s1156_s4 + $0x78] sm:$0xff] %v757_v49 }

</bundles_post_ra>
